<compile_context>
chip_gen: v6e
topology: v6e:2x2x1
jax: 0.10.0
libtpu: 0.0.40
codegen_flags: <defaults>
</compile_context>

<pallas_src>
import jax
import jax.numpy as jnp
from jax import lax
from jax.experimental import pallas as pl
from jax.experimental.pallas import tpu as pltpu


def sql_comparison_kernel(tok_ref, emb_ref, wih_ref, whh_ref, b_ref,
                          wfc_ref, bfc_ref, wout_ref, bout_ref, out_ref):
    TB = tok_ref.shape[0]          # T * Bp
    V, _ = emb_ref.shape
    H = whh_ref.shape[0]           # whh is (H, 4H), pre-transposed
    Bp = out_ref.shape[0]          # padded batch (multiple of 8)
    T = TB // Bp

    # ---- pre-loop: embedding lookup + input projection for ALL timesteps at once ----
    toks = tok_ref[...]                                                      # (T*Bp, 1) int32
    one_hot = (lax.broadcasted_iota(jnp.int32, (TB, V), 1) == toks).astype(jnp.float32)
    x_all = jnp.dot(one_hot, emb_ref[...],
                    preferred_element_type=jnp.float32)                      # (TB, E)
    zx_all = (jnp.dot(x_all, wih_ref[...],
                      preferred_element_type=jnp.float32)
              + b_ref[...])                                                  # (TB, 4H), bias folded once

    whh = whh_ref[...]                                                       # (H, 4H)
    h = jnp.zeros((Bp, H), jnp.float32)
    c = jnp.zeros((Bp, H), jnp.float32)

    # T is static and small: fully unroll at trace time with static, sublane-aligned slices.
    for t in range(T):
        zx_t = zx_all[t * Bp:(t + 1) * Bp, :]                                # (Bp, 4H)
        # Only the h @ W_hh matmul remains on the serial critical path.
        z = zx_t + jnp.dot(h, whh, preferred_element_type=jnp.float32)       # (Bp, 4H)
        # One sigmoid + one tanh over the full 128-lane vreg (PyTorch gate order i,f,g,o).
        sig_z = jax.nn.sigmoid(z)
        tanh_z = jnp.tanh(z)
        i = sig_z[:, 0 * H:1 * H]
        f = sig_z[:, 1 * H:2 * H]
        g = tanh_z[:, 2 * H:3 * H]
        o = sig_z[:, 3 * H:4 * H]
        c = f * c + i * g
        h = o * jnp.tanh(c)

    # ---- fc -> ReLU -> out -> L2 normalize ----
    hid = jnp.dot(h, wfc_ref[...], preferred_element_type=jnp.float32) + bfc_ref[...]
    hid = jnp.maximum(hid, 0.0)
    hid = jnp.dot(hid, wout_ref[...], preferred_element_type=jnp.float32) + bout_ref[...]

    # F.normalize(p=2, dim=1, eps=1e-12): x / max(||x||, eps) == x * rsqrt(max(||x||^2, eps^2))
    sumsq = jnp.sum(hid * hid, axis=1, keepdims=True)
    out_ref[...] = hid * lax.rsqrt(jnp.maximum(sumsq, 1e-24))


def sql_comparison_forward(tokens, params):
    (emb, w_ih_t, w_hh_t, b_gates, w_fc_t, b_fc, w_out_t, b_out) = params
    B, T = tokens.shape
    hidden_dim = w_out_t.shape[1]

    # Pad batch to a sublane multiple (>= 8) so each timestep slab is tile-aligned.
    Bp = max(8, ((B + 7) // 8) * 8)
    tok_pad = jnp.zeros((Bp, T), jnp.int32).at[:B, :].set(tokens.astype(jnp.int32))
    # Layout (T*Bp, 1): row r = t*Bp + b, so timestep t occupies a contiguous aligned slab.
    tok_tb = tok_pad.T.reshape(T * Bp, 1)

    vmem = pl.BlockSpec(memory_space=pltpu.MemorySpace.VMEM)
    out = pl.pallas_call(
        sql_comparison_kernel,
        out_shape=jax.ShapeDtypeStruct((Bp, hidden_dim), jnp.float32),
        in_specs=[vmem] * 9,
        out_specs=vmem,
    )(tok_tb, emb, w_ih_t, w_hh_t, b_gates, w_fc_t, b_fc, w_out_t, b_out)
    return out[:B]


def reference_forward(tokens, params):
    """Pure-JAX reference (mirrors the PyTorch module)."""
    (emb, w_ih_t, w_hh_t, b_gates, w_fc_t, b_fc, w_out_t, b_out) = params
    B, T = tokens.shape
    H = w_hh_t.shape[0]
    x = emb[tokens]                                        # (B, T, E)
    h = jnp.zeros((B, H), jnp.float32)
    c = jnp.zeros((B, H), jnp.float32)
    for t in range(T):
        z = x[:, t] @ w_ih_t + h @ w_hh_t + b_gates
        i = jax.nn.sigmoid(z[:, 0 * H:1 * H])
        f = jax.nn.sigmoid(z[:, 1 * H:2 * H])
        g = jnp.tanh(z[:, 2 * H:3 * H])
        o = jax.nn.sigmoid(z[:, 3 * H:4 * H])
        c = f * c + i * g
        h = o * jnp.tanh(c)
    hid = jnp.maximum(h @ w_fc_t + b_fc, 0.0)
    hid = hid @ w_out_t + b_out
    norm = jnp.sqrt(jnp.sum(hid * hid, axis=1, keepdims=True))
    return hid / jnp.maximum(norm, 1e-12)


if __name__ == "__main__":
    # Small shapes consistent with the module's forward.
    VOCAB, EMB_DIM, HIDDEN_DIM, LSTM_HIDDEN = 64, 16, 32, 32
    B, T = 4, 8

    key = jax.random.PRNGKey(0)
    ks = jax.random.split(key, 10)

    # Deterministic parameter init (synthetic, not a checkpoint load).
    emb = 0.1 * jax.random.normal(ks[0], (VOCAB, EMB_DIM), jnp.float32)
    w_ih = 0.1 * jax.random.normal(ks[1], (4 * LSTM_HIDDEN, EMB_DIM), jnp.float32)
    w_hh = 0.1 * jax.random.normal(ks[2], (4 * LSTM_HIDDEN, LSTM_HIDDEN), jnp.float32)
    b_ih = 0.1 * jax.random.normal(ks[3], (4 * LSTM_HIDDEN,), jnp.float32)
    b_hh = 0.1 * jax.random.normal(ks[4], (4 * LSTM_HIDDEN,), jnp.float32)
    w_fc = 0.1 * jax.random.normal(ks[5], (HIDDEN_DIM, LSTM_HIDDEN), jnp.float32)
    b_fc = 0.1 * jax.random.normal(ks[6], (HIDDEN_DIM,), jnp.float32)
    w_out = 0.1 * jax.random.normal(ks[7], (HIDDEN_DIM, HIDDEN_DIM), jnp.float32)
    b_out = 0.1 * jax.random.normal(ks[8], (HIDDEN_DIM,), jnp.float32)

    # Glue: pre-transpose weights to (in, out), combine LSTM biases, make biases 2D.
    params = (
        emb,
        w_ih.T,                                  # (E, 4H)
        w_hh.T,                                  # (H, 4H)
        (b_ih + b_hh).reshape(1, 4 * LSTM_HIDDEN),
        w_fc.T,                                  # (H, hidden_dim)
        b_fc.reshape(1, HIDDEN_DIM),
        w_out.T,                                 # (hidden_dim, hidden_dim)
        b_out.reshape(1, HIDDEN_DIM),
    )

    tokens = jax.random.randint(ks[9], (B, T), 0, VOCAB, dtype=jnp.int32)

    out = sql_comparison_forward(tokens, params)
    out = jax.block_until_ready(out)

    ref = reference_forward(tokens, params)
    assert out.shape == (B, HIDDEN_DIM)
    assert jnp.allclose(out, ref, atol=1e-4, rtol=1e-4), "mismatch vs pure-JAX reference"

    print("KERNEL_OK")
</pallas_src>

<mosaic_0001>
module attributes {stable_mosaic.version = 11 : i64} {
  func.func @sql_comparison_kernel(%arg0: memref<64x1xi32, #tpu.memory_space<vmem>>, %arg1: memref<64x16xf32, #tpu.memory_space<vmem>>, %arg2: memref<16x128xf32, #tpu.memory_space<vmem>>, %arg3: memref<32x128xf32, #tpu.memory_space<vmem>>, %arg4: memref<1x128xf32, #tpu.memory_space<vmem>>, %arg5: memref<32x32xf32, #tpu.memory_space<vmem>>, %arg6: memref<1x32xf32, #tpu.memory_space<vmem>>, %arg7: memref<32x32xf32, #tpu.memory_space<vmem>>, %arg8: memref<1x32xf32, #tpu.memory_space<vmem>>, %arg9: memref<8x32xf32, #tpu.memory_space<vmem>>) attributes {dimension_semantics = [], scalar_prefetch = 0 : i64, scratch_operands = 0 : i64, tpu.core_type = #tpu.core_type<tc>} {
    %c0 = arith.constant 0 : index
    %c0_0 = arith.constant 0 : index
    %0 = vector.load %arg0[%c0, %c0_0] : memref<64x1xi32, #tpu.memory_space<vmem>>, vector<64x1xi32>
    %1 = tpu.iota {dimensions = array<i32: 1>} : vector<64x64xi32>
    %2 = vector.broadcast %0 : vector<64x1xi32> to vector<64x64xi32>
    %3 = arith.cmpi eq, %1, %2 : vector<64x64xi32>
    %4 = arith.extui %3 : vector<64x64xi1> to vector<64x64xi32>
    %5 = arith.sitofp %4 : vector<64x64xi32> to vector<64x64xf32>
    %c0_1 = arith.constant 0 : index
    %c0_2 = arith.constant 0 : index
    %6 = vector.load %arg1[%c0_1, %c0_2] : memref<64x16xf32, #tpu.memory_space<vmem>>, vector<64x16xf32>
    %cst = arith.constant dense<0.000000e+00> : vector<64x16xf32>
    %7 = tpu.matmul %5, %6, %cst {dimension_numbers = #tpu.dot_dimension_numbers<[1], [0], [0], [1], [0, 0, 1, 1], [], []>} : vector<64x64xf32>, vector<64x16xf32>, vector<64x16xf32> -> vector<64x16xf32>
    %c0_3 = arith.constant 0 : index
    %c0_4 = arith.constant 0 : index
    %8 = vector.load %arg2[%c0_3, %c0_4] : memref<16x128xf32, #tpu.memory_space<vmem>>, vector<16x128xf32>
    %cst_5 = arith.constant dense<0.000000e+00> : vector<64x128xf32>
    %9 = tpu.matmul %7, %8, %cst_5 {dimension_numbers = #tpu.dot_dimension_numbers<[1], [0], [0], [1], [0, 0, 1, 1], [], []>} : vector<64x16xf32>, vector<16x128xf32>, vector<64x128xf32> -> vector<64x128xf32>
    %c0_6 = arith.constant 0 : index
    %c0_7 = arith.constant 0 : index
    %10 = vector.load %arg4[%c0_6, %c0_7] : memref<1x128xf32, #tpu.memory_space<vmem>>, vector<1x128xf32>
    %11 = vector.broadcast %10 : vector<1x128xf32> to vector<64x128xf32>
    %12 = arith.addf %9, %11 : vector<64x128xf32>
    %c0_8 = arith.constant 0 : index
    %c0_9 = arith.constant 0 : index
    %13 = vector.load %arg3[%c0_8, %c0_9] : memref<32x128xf32, #tpu.memory_space<vmem>>, vector<32x128xf32>
    %cst_10 = arith.constant 0.000000e+00 : f32
    %14 = vector.broadcast %cst_10 : f32 to vector<8x32xf32>
    %cst_11 = arith.constant 0.000000e+00 : f32
    %15 = vector.broadcast %cst_11 : f32 to vector<8x32xf32>
    %16 = vector.extract_strided_slice %12 {offsets = [0, 0], sizes = [8, 128], strides = [1, 1]} : vector<64x128xf32> to vector<8x128xf32>
    %cst_12 = arith.constant dense<0.000000e+00> : vector<8x128xf32>
    %17 = tpu.matmul %14, %13, %cst_12 {dimension_numbers = #tpu.dot_dimension_numbers<[1], [0], [0], [1], [0, 0, 1, 1], [], []>} : vector<8x32xf32>, vector<32x128xf32>, vector<8x128xf32> -> vector<8x128xf32>
    %18 = arith.addf %16, %17 : vector<8x128xf32>
    %19 = arith.negf %18 : vector<8x128xf32>
    %20 = math.exp %19 : vector<8x128xf32>
    %cst_13 = arith.constant 1.000000e+00 : f32
    %21 = vector.broadcast %cst_13 : f32 to vector<8x128xf32>
    %22 = arith.addf %21, %20 : vector<8x128xf32>
    %23 = arith.divf %21, %22 : vector<8x128xf32>
    %24 = math.tanh %18 : vector<8x128xf32>
    %25 = vector.extract_strided_slice %23 {offsets = [0, 0], sizes = [8, 32], strides = [1, 1]} : vector<8x128xf32> to vector<8x32xf32>
    %26 = vector.extract_strided_slice %23 {offsets = [0, 32], sizes = [8, 32], strides = [1, 1]} : vector<8x128xf32> to vector<8x32xf32>
    %27 = vector.extract_strided_slice %24 {offsets = [0, 64], sizes = [8, 32], strides = [1, 1]} : vector<8x128xf32> to vector<8x32xf32>
    %28 = vector.extract_strided_slice %23 {offsets = [0, 96], sizes = [8, 32], strides = [1, 1]} : vector<8x128xf32> to vector<8x32xf32>
    %29 = arith.mulf %26, %15 : vector<8x32xf32>
    %30 = arith.mulf %25, %27 : vector<8x32xf32>
    %31 = arith.addf %29, %30 : vector<8x32xf32>
    %32 = math.tanh %31 : vector<8x32xf32>
    %33 = arith.mulf %28, %32 : vector<8x32xf32>
    %34 = vector.extract_strided_slice %12 {offsets = [8, 0], sizes = [8, 128], strides = [1, 1]} : vector<64x128xf32> to vector<8x128xf32>
    %cst_14 = arith.constant dense<0.000000e+00> : vector<8x128xf32>
    %35 = tpu.matmul %33, %13, %cst_14 {dimension_numbers = #tpu.dot_dimension_numbers<[1], [0], [0], [1], [0, 0, 1, 1], [], []>} : vector<8x32xf32>, vector<32x128xf32>, vector<8x128xf32> -> vector<8x128xf32>
    %36 = arith.addf %34, %35 : vector<8x128xf32>
    %37 = arith.negf %36 : vector<8x128xf32>
    %38 = math.exp %37 : vector<8x128xf32>
    %cst_15 = arith.constant 1.000000e+00 : f32
    %39 = vector.broadcast %cst_15 : f32 to vector<8x128xf32>
    %40 = arith.addf %39, %38 : vector<8x128xf32>
    %41 = arith.divf %39, %40 : vector<8x128xf32>
    %42 = math.tanh %36 : vector<8x128xf32>
    %43 = vector.extract_strided_slice %41 {offsets = [0, 0], sizes = [8, 32], strides = [1, 1]} : vector<8x128xf32> to vector<8x32xf32>
    %44 = vector.extract_strided_slice %41 {offsets = [0, 32], sizes = [8, 32], strides = [1, 1]} : vector<8x128xf32> to vector<8x32xf32>
    %45 = vector.extract_strided_slice %42 {offsets = [0, 64], sizes = [8, 32], strides = [1, 1]} : vector<8x128xf32> to vector<8x32xf32>
    %46 = vector.extract_strided_slice %41 {offsets = [0, 96], sizes = [8, 32], strides = [1, 1]} : vector<8x128xf32> to vector<8x32xf32>
    %47 = arith.mulf %44, %31 : vector<8x32xf32>
    %48 = arith.mulf %43, %45 : vector<8x32xf32>
    %49 = arith.addf %47, %48 : vector<8x32xf32>
    %50 = math.tanh %49 : vector<8x32xf32>
    %51 = arith.mulf %46, %50 : vector<8x32xf32>
    %52 = vector.extract_strided_slice %12 {offsets = [16, 0], sizes = [8, 128], strides = [1, 1]} : vector<64x128xf32> to vector<8x128xf32>
    %cst_16 = arith.constant dense<0.000000e+00> : vector<8x128xf32>
    %53 = tpu.matmul %51, %13, %cst_16 {dimension_numbers = #tpu.dot_dimension_numbers<[1], [0], [0], [1], [0, 0, 1, 1], [], []>} : vector<8x32xf32>, vector<32x128xf32>, vector<8x128xf32> -> vector<8x128xf32>
    %54 = arith.addf %52, %53 : vector<8x128xf32>
    %55 = arith.negf %54 : vector<8x128xf32>
    %56 = math.exp %55 : vector<8x128xf32>
    %cst_17 = arith.constant 1.000000e+00 : f32
    %57 = vector.broadcast %cst_17 : f32 to vector<8x128xf32>
    %58 = arith.addf %57, %56 : vector<8x128xf32>
    %59 = arith.divf %57, %58 : vector<8x128xf32>
    %60 = math.tanh %54 : vector<8x128xf32>
    %61 = vector.extract_strided_slice %59 {offsets = [0, 0], sizes = [8, 32], strides = [1, 1]} : vector<8x128xf32> to vector<8x32xf32>
    %62 = vector.extract_strided_slice %59 {offsets = [0, 32], sizes = [8, 32], strides = [1, 1]} : vector<8x128xf32> to vector<8x32xf32>
    %63 = vector.extract_strided_slice %60 {offsets = [0, 64], sizes = [8, 32], strides = [1, 1]} : vector<8x128xf32> to vector<8x32xf32>
    %64 = vector.extract_strided_slice %59 {offsets = [0, 96], sizes = [8, 32], strides = [1, 1]} : vector<8x128xf32> to vector<8x32xf32>
    %65 = arith.mulf %62, %49 : vector<8x32xf32>
    %66 = arith.mulf %61, %63 : vector<8x32xf32>
    %67 = arith.addf %65, %66 : vector<8x32xf32>
    %68 = math.tanh %67 : vector<8x32xf32>
    %69 = arith.mulf %64, %68 : vector<8x32xf32>
    %70 = vector.extract_strided_slice %12 {offsets = [24, 0], sizes = [8, 128], strides = [1, 1]} : vector<64x128xf32> to vector<8x128xf32>
    %cst_18 = arith.constant dense<0.000000e+00> : vector<8x128xf32>
    %71 = tpu.matmul %69, %13, %cst_18 {dimension_numbers = #tpu.dot_dimension_numbers<[1], [0], [0], [1], [0, 0, 1, 1], [], []>} : vector<8x32xf32>, vector<32x128xf32>, vector<8x128xf32> -> vector<8x128xf32>
    %72 = arith.addf %70, %71 : vector<8x128xf32>
    %73 = arith.negf %72 : vector<8x128xf32>
    %74 = math.exp %73 : vector<8x128xf32>
    %cst_19 = arith.constant 1.000000e+00 : f32
    %75 = vector.broadcast %cst_19 : f32 to vector<8x128xf32>
    %76 = arith.addf %75, %74 : vector<8x128xf32>
    %77 = arith.divf %75, %76 : vector<8x128xf32>
    %78 = math.tanh %72 : vector<8x128xf32>
    %79 = vector.extract_strided_slice %77 {offsets = [0, 0], sizes = [8, 32], strides = [1, 1]} : vector<8x128xf32> to vector<8x32xf32>
    %80 = vector.extract_strided_slice %77 {offsets = [0, 32], sizes = [8, 32], strides = [1, 1]} : vector<8x128xf32> to vector<8x32xf32>
    %81 = vector.extract_strided_slice %78 {offsets = [0, 64], sizes = [8, 32], strides = [1, 1]} : vector<8x128xf32> to vector<8x32xf32>
    %82 = vector.extract_strided_slice %77 {offsets = [0, 96], sizes = [8, 32], strides = [1, 1]} : vector<8x128xf32> to vector<8x32xf32>
    %83 = arith.mulf %80, %67 : vector<8x32xf32>
    %84 = arith.mulf %79, %81 : vector<8x32xf32>
    %85 = arith.addf %83, %84 : vector<8x32xf32>
    %86 = math.tanh %85 : vector<8x32xf32>
    %87 = arith.mulf %82, %86 : vector<8x32xf32>
    %88 = vector.extract_strided_slice %12 {offsets = [32, 0], sizes = [8, 128], strides = [1, 1]} : vector<64x128xf32> to vector<8x128xf32>
    %cst_20 = arith.constant dense<0.000000e+00> : vector<8x128xf32>
    %89 = tpu.matmul %87, %13, %cst_20 {dimension_numbers = #tpu.dot_dimension_numbers<[1], [0], [0], [1], [0, 0, 1, 1], [], []>} : vector<8x32xf32>, vector<32x128xf32>, vector<8x128xf32> -> vector<8x128xf32>
    %90 = arith.addf %88, %89 : vector<8x128xf32>
    %91 = arith.negf %90 : vector<8x128xf32>
    %92 = math.exp %91 : vector<8x128xf32>
    %cst_21 = arith.constant 1.000000e+00 : f32
    %93 = vector.broadcast %cst_21 : f32 to vector<8x128xf32>
    %94 = arith.addf %93, %92 : vector<8x128xf32>
    %95 = arith.divf %93, %94 : vector<8x128xf32>
    %96 = math.tanh %90 : vector<8x128xf32>
    %97 = vector.extract_strided_slice %95 {offsets = [0, 0], sizes = [8, 32], strides = [1, 1]} : vector<8x128xf32> to vector<8x32xf32>
    %98 = vector.extract_strided_slice %95 {offsets = [0, 32], sizes = [8, 32], strides = [1, 1]} : vector<8x128xf32> to vector<8x32xf32>
    %99 = vector.extract_strided_slice %96 {offsets = [0, 64], sizes = [8, 32], strides = [1, 1]} : vector<8x128xf32> to vector<8x32xf32>
    %100 = vector.extract_strided_slice %95 {offsets = [0, 96], sizes = [8, 32], strides = [1, 1]} : vector<8x128xf32> to vector<8x32xf32>
    %101 = arith.mulf %98, %85 : vector<8x32xf32>
    %102 = arith.mulf %97, %99 : vector<8x32xf32>
    %103 = arith.addf %101, %102 : vector<8x32xf32>
    %104 = math.tanh %103 : vector<8x32xf32>
    %105 = arith.mulf %100, %104 : vector<8x32xf32>
    %106 = vector.extract_strided_slice %12 {offsets = [40, 0], sizes = [8, 128], strides = [1, 1]} : vector<64x128xf32> to vector<8x128xf32>
    %cst_22 = arith.constant dense<0.000000e+00> : vector<8x128xf32>
    %107 = tpu.matmul %105, %13, %cst_22 {dimension_numbers = #tpu.dot_dimension_numbers<[1], [0], [0], [1], [0, 0, 1, 1], [], []>} : vector<8x32xf32>, vector<32x128xf32>, vector<8x128xf32> -> vector<8x128xf32>
    %108 = arith.addf %106, %107 : vector<8x128xf32>
    %109 = arith.negf %108 : vector<8x128xf32>
    %110 = math.exp %109 : vector<8x128xf32>
    %cst_23 = arith.constant 1.000000e+00 : f32
    %111 = vector.broadcast %cst_23 : f32 to vector<8x128xf32>
    %112 = arith.addf %111, %110 : vector<8x128xf32>
    %113 = arith.divf %111, %112 : vector<8x128xf32>
    %114 = math.tanh %108 : vector<8x128xf32>
    %115 = vector.extract_strided_slice %113 {offsets = [0, 0], sizes = [8, 32], strides = [1, 1]} : vector<8x128xf32> to vector<8x32xf32>
    %116 = vector.extract_strided_slice %113 {offsets = [0, 32], sizes = [8, 32], strides = [1, 1]} : vector<8x128xf32> to vector<8x32xf32>
    %117 = vector.extract_strided_slice %114 {offsets = [0, 64], sizes = [8, 32], strides = [1, 1]} : vector<8x128xf32> to vector<8x32xf32>
    %118 = vector.extract_strided_slice %113 {offsets = [0, 96], sizes = [8, 32], strides = [1, 1]} : vector<8x128xf32> to vector<8x32xf32>
    %119 = arith.mulf %116, %103 : vector<8x32xf32>
    %120 = arith.mulf %115, %117 : vector<8x32xf32>
    %121 = arith.addf %119, %120 : vector<8x32xf32>
    %122 = math.tanh %121 : vector<8x32xf32>
    %123 = arith.mulf %118, %122 : vector<8x32xf32>
    %124 = vector.extract_strided_slice %12 {offsets = [48, 0], sizes = [8, 128], strides = [1, 1]} : vector<64x128xf32> to vector<8x128xf32>
    %cst_24 = arith.constant dense<0.000000e+00> : vector<8x128xf32>
    %125 = tpu.matmul %123, %13, %cst_24 {dimension_numbers = #tpu.dot_dimension_numbers<[1], [0], [0], [1], [0, 0, 1, 1], [], []>} : vector<8x32xf32>, vector<32x128xf32>, vector<8x128xf32> -> vector<8x128xf32>
    %126 = arith.addf %124, %125 : vector<8x128xf32>
    %127 = arith.negf %126 : vector<8x128xf32>
    %128 = math.exp %127 : vector<8x128xf32>
    %cst_25 = arith.constant 1.000000e+00 : f32
    %129 = vector.broadcast %cst_25 : f32 to vector<8x128xf32>
    %130 = arith.addf %129, %128 : vector<8x128xf32>
    %131 = arith.divf %129, %130 : vector<8x128xf32>
    %132 = math.tanh %126 : vector<8x128xf32>
    %133 = vector.extract_strided_slice %131 {offsets = [0, 0], sizes = [8, 32], strides = [1, 1]} : vector<8x128xf32> to vector<8x32xf32>
    %134 = vector.extract_strided_slice %131 {offsets = [0, 32], sizes = [8, 32], strides = [1, 1]} : vector<8x128xf32> to vector<8x32xf32>
    %135 = vector.extract_strided_slice %132 {offsets = [0, 64], sizes = [8, 32], strides = [1, 1]} : vector<8x128xf32> to vector<8x32xf32>
    %136 = vector.extract_strided_slice %131 {offsets = [0, 96], sizes = [8, 32], strides = [1, 1]} : vector<8x128xf32> to vector<8x32xf32>
    %137 = arith.mulf %134, %121 : vector<8x32xf32>
    %138 = arith.mulf %133, %135 : vector<8x32xf32>
    %139 = arith.addf %137, %138 : vector<8x32xf32>
    %140 = math.tanh %139 : vector<8x32xf32>
    %141 = arith.mulf %136, %140 : vector<8x32xf32>
    %142 = vector.extract_strided_slice %12 {offsets = [56, 0], sizes = [8, 128], strides = [1, 1]} : vector<64x128xf32> to vector<8x128xf32>
    %cst_26 = arith.constant dense<0.000000e+00> : vector<8x128xf32>
    %143 = tpu.matmul %141, %13, %cst_26 {dimension_numbers = #tpu.dot_dimension_numbers<[1], [0], [0], [1], [0, 0, 1, 1], [], []>} : vector<8x32xf32>, vector<32x128xf32>, vector<8x128xf32> -> vector<8x128xf32>
    %144 = arith.addf %142, %143 : vector<8x128xf32>
    %145 = arith.negf %144 : vector<8x128xf32>
    %146 = math.exp %145 : vector<8x128xf32>
    %cst_27 = arith.constant 1.000000e+00 : f32
    %147 = vector.broadcast %cst_27 : f32 to vector<8x128xf32>
    %148 = arith.addf %147, %146 : vector<8x128xf32>
    %149 = arith.divf %147, %148 : vector<8x128xf32>
    %150 = math.tanh %144 : vector<8x128xf32>
    %151 = vector.extract_strided_slice %149 {offsets = [0, 0], sizes = [8, 32], strides = [1, 1]} : vector<8x128xf32> to vector<8x32xf32>
    %152 = vector.extract_strided_slice %149 {offsets = [0, 32], sizes = [8, 32], strides = [1, 1]} : vector<8x128xf32> to vector<8x32xf32>
    %153 = vector.extract_strided_slice %150 {offsets = [0, 64], sizes = [8, 32], strides = [1, 1]} : vector<8x128xf32> to vector<8x32xf32>
    %154 = vector.extract_strided_slice %149 {offsets = [0, 96], sizes = [8, 32], strides = [1, 1]} : vector<8x128xf32> to vector<8x32xf32>
    %155 = arith.mulf %152, %139 : vector<8x32xf32>
    %156 = arith.mulf %151, %153 : vector<8x32xf32>
    %157 = arith.addf %155, %156 : vector<8x32xf32>
    %158 = math.tanh %157 : vector<8x32xf32>
    %159 = arith.mulf %154, %158 : vector<8x32xf32>
    %c0_28 = arith.constant 0 : index
    %c0_29 = arith.constant 0 : index
    %160 = vector.load %arg5[%c0_28, %c0_29] : memref<32x32xf32, #tpu.memory_space<vmem>>, vector<32x32xf32>
    %cst_30 = arith.constant dense<0.000000e+00> : vector<8x32xf32>
    %161 = tpu.matmul %159, %160, %cst_30 {dimension_numbers = #tpu.dot_dimension_numbers<[1], [0], [0], [1], [0, 0, 1, 1], [], []>} : vector<8x32xf32>, vector<32x32xf32>, vector<8x32xf32> -> vector<8x32xf32>
    %c0_31 = arith.constant 0 : index
    %c0_32 = arith.constant 0 : index
    %162 = vector.load %arg6[%c0_31, %c0_32] : memref<1x32xf32, #tpu.memory_space<vmem>>, vector<1x32xf32>
    %163 = vector.broadcast %162 : vector<1x32xf32> to vector<8x32xf32>
    %164 = arith.addf %161, %163 : vector<8x32xf32>
    %cst_33 = arith.constant 0.000000e+00 : f32
    %165 = vector.broadcast %cst_33 : f32 to vector<8x32xf32>
    %166 = arith.maximumf %164, %165 : vector<8x32xf32>
    %c0_34 = arith.constant 0 : index
    %c0_35 = arith.constant 0 : index
    %167 = vector.load %arg7[%c0_34, %c0_35] : memref<32x32xf32, #tpu.memory_space<vmem>>, vector<32x32xf32>
    %cst_36 = arith.constant dense<0.000000e+00> : vector<8x32xf32>
    %168 = tpu.matmul %166, %167, %cst_36 {dimension_numbers = #tpu.dot_dimension_numbers<[1], [0], [0], [1], [0, 0, 1, 1], [], []>} : vector<8x32xf32>, vector<32x32xf32>, vector<8x32xf32> -> vector<8x32xf32>
    %c0_37 = arith.constant 0 : index
    %c0_38 = arith.constant 0 : index
    %169 = vector.load %arg8[%c0_37, %c0_38] : memref<1x32xf32, #tpu.memory_space<vmem>>, vector<1x32xf32>
    %170 = vector.broadcast %169 : vector<1x32xf32> to vector<8x32xf32>
    %171 = arith.addf %168, %170 : vector<8x32xf32>
    %172 = arith.mulf %171, %171 : vector<8x32xf32>
    %cst_39 = arith.constant dense<0.000000e+00> : vector<8xf32>
    %173 = vector.multi_reduction <add>, %172, %cst_39 [1] : vector<8x32xf32> to vector<8xf32>
    %174 = vector.shape_cast %173 : vector<8xf32> to vector<8x1xf32>
    %cst_40 = arith.constant 1.000000e-24 : f32
    %175 = vector.broadcast %cst_40 : f32 to vector<8x1xf32>
    %176 = arith.maximumf %174, %175 : vector<8x1xf32>
    %177 = math.rsqrt %176 : vector<8x1xf32>
    %178 = vector.broadcast %177 : vector<8x1xf32> to vector<8x32xf32>
    %179 = arith.mulf %171, %178 : vector<8x32xf32>
    %c0_41 = arith.constant 0 : index
    %c0_42 = arith.constant 0 : index
    %180 = vector.load %arg9[%c0_41, %c0_42] : memref<8x32xf32, #tpu.memory_space<vmem>>, vector<8x32xf32>
    tpu.vector_store %arg9[%c0_41, %c0_42], %179 {strides = array<i32>} : memref<8x32xf32, #tpu.memory_space<vmem>>, vector<8x32xf32>,
    return
  }
}

</mosaic_0001>

<bundles_post_ra>
// kernel: tpu_custom_call.1
= control target key start
LH: loop header
LB: loop body
LE: loop exit
PB: predicated region body
PF: predicated region fallthrough
CT: control target
= control target key end

     0   :  { %v1734_v2 = vmov 0   ;;  %s2078_s0 = inlined_call_operand.vmem [shape: s32[64,1], index: 0, kind: input, shape index: {}]   ;;  %s2079_s1 = inlined_call_operand.vmem [shape: f32[64,16], index: 1, kind: input, shape index: {}]   ;;  %s2080_s2 = inlined_call_operand.vmem [shape: f32[16,128], index: 2, kind: input, shape index: {}]   ;;  %s2081_s3 = inlined_call_operand.vmem [shape: f32[32,128], index: 3, kind: input, shape index: {}]   ;;  %s2082_s4 = inlined_call_operand.vmem [shape: f32[1,128], index: 4, kind: input, shape index: {}]   ;;  %s2083_s5 = inlined_call_operand.vmem [shape: f32[32,32], index: 5, kind: input, shape index: {}]   ;;  %s2084_s6 = inlined_call_operand.vmem [shape: f32[1,32], index: 6, kind: input, shape index: {}]   ;;  %s2085_s7 = inlined_call_operand.vmem [shape: f32[32,32], index: 7, kind: input, shape index: {}]   ;;  %s2086_s8 = inlined_call_operand.vmem [shape: f32[1,32], index: 8, kind: input, shape index: {}]   ;;  %s2087_s9 = inlined_call_operand.hbm [shape: f32[8,32], index: 9, kind: output, shape index: {}]  }
   0x1   :  { %v35_v0 = vld [vmem:[%s2078_s0 + $0x10] sm:$0xff]  ;;  %v33_v1 = vld [vmem:[%s2078_s0] sm:$0xff]  ;;  %1645 = vset.pattern.permute.xlu1 %v1734_v2  ;;  %1644 = vset.pattern.permute.xlu0 %v1734_v2  ;;  %v98_v3 = vld [vmem:[%s2079_s1 + $0x38] sm:$0xff] }
   0x2   :  { %50 = vperm.xlu1 %1645, %v35_v0   ;;  %44 = vperm.xlu0 %1644, %v33_v1   ;;  %v36_v4 = vld [vmem:[%s2078_s0 + $0x18] sm:$0xff]  ;;  %v34_v5 = vld [vmem:[%s2078_s0 + $0x8] sm:$0xff]  ;;  %v97_v6 = vld [vmem:[%s2079_s1 + $0x30] sm:$0xff] }
   0x3   :  { %1484 = vmatprep.subr.mxu0 %v98_v3  ;;  %v96_v7 = vld [vmem:[%s2079_s1 + $0x28] sm:$0xff] }
   0x4   :  { %1485 = vmatpush3.msra.mxu0 %v98_v3 }
   0x5   :  { %1486 = vmatprep.subr.mxu0 %v97_v6 }
   0x6   :  { %14 = vsyncpa [#allocation3], 0  ;;  %53 = vperm.xlu1 %1645, %v36_v4   ;;  %47 = vperm.xlu0 %1644, %v34_v5   ;;  %v38_v8 = vld [vmem:[%s2078_s0 + $0x28] sm:$0xff]  ;;  %v37_v9 = vld [vmem:[%s2078_s0 + $0x20] sm:$0xff]  ;;  %v1735_v18 = vmov 0.0   ;;  %v41_v19 = vlaneseq  ;;  %vm99_vm0 = vcmask 523264  }
   0x7   :  { %1487 = vmatpush3.msra.mxu0 %v97_v6  ;;  %v95_v10 = vld [vmem:[%s2079_s1 + $0x20] sm:$0xff]  ;;  %v94_v11 = vld [vmem:[%s2079_s1 + $0x18] sm:$0xff]  ;;  %v39_v13 = vld [vmem:[%s2078_s0 + $0x30] sm:$0xff]  ;;  %vm1736_vm9 = vmmov 0   ;;  %vm238_vm10 = vcmask 130048   ;;  %s1738_s30 = smov 32  }
   0x8   :  { %1488 = vmatprep.subr.mxu0 %v96_v7  ;;  %v40_v12 = vld [vmem:[%s2078_s0 + $0x38] sm:$0xff]  ;;  %v93_v14 = vld [vmem:[%s2079_s1 + $0x10] sm:$0xff]  ;;  %v92_v15 = vld [vmem:[%s2079_s1 + $0x8] sm:$0xff]  ;;  %v42_v20 = vand.u32 127, %v41_v19  ;;  %vm372_vm11 = vcmask 261120  }
   0x9   :  { %1489 = vmatpush3.msra.mxu0 %v96_v7  ;;  %v230_v16 = vld [vmem:[%s2080_s2 + $0x8] sm:$0xff]  ;;  %v91_v17 = vld [vmem:[%s2079_s1] sm:$0xff]  ;;  %v1865_v38 = vld [vmem:[%s2081_s3 + $0x18] sm:$0xff] }
   0xa   :  { %59 = vperm.xlu1 %1645, %v38_v8   ;;  %56 = vperm.xlu0 %1644, %v37_v9   ;;  %v229_v37 = vld [vmem:[%s2080_s2] sm:$0xff]  ;;  %v1872_v39 = vld [vmem:[%s2081_s3 + $0x10] sm:$0xff]  ;;  %v1879_v40 = vld [vmem:[%s2081_s3 + $0x8] sm:$0xff] }
   0xb   :  { %1490 = vmatprep.subr.mxu0 %v95_v10  ;;  %1512 = vmatprep.subr.mxu1 %v230_v16  ;;  %v1886_v41 = vld [vmem:[%s2081_s3] sm:$0xff] }
   0xc   :  { %1491 = vmatpush3.msra.mxu0 %v95_v10  ;;  %1513 = vmatpush3.msra.mxu1 %v230_v16  ;;  %v1380_v50 = vld [vmem:[%s2082_s4] ss:$0 sm:$0xff]  ;;  %s1737_s4 = smov 64  }
   0xd   :  { %1492 = vmatprep.subr.mxu0 %v94_v11  ;;  %1514 = vmatprep.subr.mxu1 %v229_v37 }
   0xe   :  { %65 = vperm.xlu1 %1645, %v40_v12   ;;  %62 = vperm.xlu0 %1644, %v39_v13  }
   0xf   :  { %1493 = vmatpush3.msra.mxu0 %v94_v11  ;;  %1515 = vmatpush3.msra.mxu1 %v229_v37 }
  0x10   :  { %1494 = vmatprep.subr.mxu0 %v93_v14  ;;  %1528 = vmatprep.subr.mxu1 %v1735_v18 }
  0x11   :  { %1495 = vmatpush3.msra.mxu0 %v93_v14 }
  0x12   :  { %1496 = vmatprep.subr.mxu0 %v92_v15 }
  0x13   :  { %1497 = vmatpush3.msra.mxu0 %v92_v15 }
  0x14   :  { %1498 = vmatprep.subr.mxu0 %v91_v17 }
  0x15   :  { %1499 = vmatpush3.msra.mxu0 %v91_v17 }
  0x16   :  { %1550 = vmatprep.subr.mxu0 %v1735_v18 }
  0x7d   :  { %v51_v21 = vpop.permute.xlu1 %50  ;;  %v45_v22 = vpop.permute.xlu0 %44 }
  0x7e   :  { %vm67_vm1 = vcmp.eq.s32.totalorder %v42_v20, %v45_v22  ;;  %vm69_vm2 = vcmp.eq.s32.totalorder %v42_v20, %v51_v21 }
  0x7f   :  { %v1364_v23 = vsel %vm67_vm1, 1.0, %v1735_v18  ;;  %v1366_v26 = vsel %vm69_vm2, 1.0, %v1735_v18 }
  0x80   :  { %1500 = vmatprep.mubr.msk.f32.mxu0 %vm99_vm0, %v1364_v23 }
  0x81   :  { %v54_v24 = vpop.permute.xlu1 %53  ;;  %v48_v25 = vpop.permute.xlu0 %47 }
  0x82   :  { %vm68_vm3 = vcmp.eq.s32.totalorder %v42_v20, %v48_v25  ;;  %vm70_vm4 = vcmp.eq.s32.totalorder %v42_v20, %v54_v24 }
  0x83   :  { %v1365_v27 = vsel %vm68_vm3, 1.0, %v1735_v18  ;;  %v1367_v30 = vsel %vm70_vm4, 1.0, %v1735_v18 }
  0x84   :  { %1501 = vmatmul.mubr.msk.f32.vlgmr.msra.gmra.mxu0 %vm99_vm0, %v1365_v27 }
  0x85   :  { %v60_v28 = vpop.permute.xlu1 %59  ;;  %1503 = vmatprep.mubr.msk.f32.mxu0 %vm99_vm0, %v1366_v26  ;;  %v57_v29 = vpop.permute.xlu0 %56  ;;  %1551 = vmatpush3.msra.mxu0 %v1865_v38 }
  0x86   :  { %vm71_vm5 = vcmp.eq.s32.totalorder %v42_v20, %v57_v29  ;;  %vm72_vm6 = vcmp.eq.s32.totalorder %v42_v20, %v60_v28  ;;  %1552 = vmatprep.subr.mxu0 %v1735_v18 }
  0x87   :  { %v1368_v31 = vsel %vm71_vm5, 1.0, %v1735_v18  ;;  %v1369_v34 = vsel %vm72_vm6, 1.0, %v1735_v18  ;;  %1553 = vmatpush3.msra.mxu0 %v1872_v39 }
  0x88   :  { %1504 = vmatmul.mubr.msk.f32.gmra.mxu0 %vm99_vm0, %v1367_v30  ;;  %1554 = vmatprep.subr.mxu0 %v1735_v18 }
  0x89   :  { %v66_v32 = vpop.permute.xlu1 %65  ;;  %1506 = vmatprep.mubr.msk.f32.mxu0 %vm99_vm0, %v1368_v31  ;;  %v63_v33 = vpop.permute.xlu0 %62  ;;  %1555 = vmatpush3.msra.mxu0 %v1879_v40 }
  0x8a   :  { %vm73_vm7 = vcmp.eq.s32.totalorder %v42_v20, %v63_v33  ;;  %vm74_vm8 = vcmp.eq.s32.totalorder %v42_v20, %v66_v32  ;;  %1556 = vmatprep.subr.mxu0 %v1735_v18 }
  0x8b   :  { %v1370_v35 = vsel %vm73_vm7, 1.0, %v1735_v18  ;;  %v1371_v36 = vsel %vm74_vm8, 1.0, %v1735_v18  ;;  %1557 = vmatpush3.msra.mxu0 %v1886_v41 }
  0x8c   :  { %1507 = vmatmul.mubr.msk.f32.gmra.mxu0 %vm99_vm0, %v1369_v34  ;;  %1572 = vmatprep.subr.mxu0 %v1735_v18 }
  0x8d   :  { %1509 = vmatprep.mubr.msk.f32.mxu0 %vm99_vm0, %v1370_v35 }
  0x90   :  { %1510 = vmatmul.mubr.msk.f32.gmra.mxu0 %vm99_vm0, %v1371_v36 }
  0x91   :  { %1558 = vmatprep.mubr.msk.f32.mxu0 %vm1736_vm9, %v1735_v18 }
 0x144   :  { %v1502_v42 = vpop.f32.mrf.mxu0 }
 0x146   :  { %v190_v43 = vpop.f32.mrf.mxu0 }
 0x147   :  { %1516 = vmatprep.mubr.msk.f32.mxu1 %vm238_vm10, %v190_v43 }
 0x148   :  { %v1505_v44 = vpop.f32.mrf.mxu0  ;;  %1517 = vmatmul.mubr.msk.f32.vlgmr.msra.gmra.mxu1 %vm238_vm10, %v1502_v42 }
 0x149   :  { %1529 = vmatpush3.msra.mxu1 %v1865_v38 }
 0x14a   :  { %v200_v45 = vpop.f32.mrf.mxu0  ;;  %1530 = vmatprep.subr.mxu1 %v1735_v18 }
 0x14b   :  { %1519 = vmatprep.mubr.msk.f32.mxu1 %vm238_vm10, %v200_v45  ;;  %1531 = vmatpush3.msra.mxu1 %v1872_v39 }
 0x14c   :  { %v1508_v46 = vpop.f32.mrf.mxu0  ;;  %1520 = vmatmul.mubr.msk.f32.gmra.mxu1 %vm238_vm10, %v1505_v44  ;;  %1532 = vmatprep.subr.mxu1 %v1735_v18 }
 0x14d   :  { %1533 = vmatpush3.msra.mxu1 %v1879_v40 }
 0x14e   :  { %v210_v47 = vpop.f32.mrf.mxu0  ;;  %1534 = vmatprep.subr.mxu1 %v1735_v18 }
 0x14f   :  { %1522 = vmatprep.mubr.msk.f32.mxu1 %vm238_vm10, %v210_v47  ;;  %1535 = vmatpush3.msra.mxu1 %v1886_v41 }
 0x150   :  { %v1511_v48 = vpop.f32.mrf.mxu0  ;;  %1523 = vmatmul.mubr.msk.f32.gmra.mxu1 %vm238_vm10, %v1508_v46  ;;  %1539 = vmatprep.subr.mxu1 %v1735_v18 }
 0x152   :  { %v220_v49 = vpop.f32.mrf.mxu0 }
 0x153   :  { %1525 = vmatprep.mubr.msk.f32.mxu1 %vm238_vm10, %v220_v49 }
 0x154   :  { %1526 = vmatmul.mubr.msk.f32.gmra.mxu1 %vm238_vm10, %v1511_v48 }
 0x155   :  { %1536 = vmatprep.mubr.msk.f32.mxu1 %vm1736_vm9, %v1735_v18 }
 0x158   :  { %1537 = vmatmul.mubr.f32.vlgmr.msra.gmra.mxu1 %v1735_v18 }
 0x159   :  { %1540 = vmatpush3.msra.mxu1 %v1865_v38  ;;  %1547 = vmatprep.mubr.msk.f32.mxu1 %vm1736_vm9, %v1735_v18 }
 0x15a   :  { %1541 = vmatprep.subr.mxu1 %v1735_v18 }
 0x15b   :  { %1542 = vmatpush3.msra.mxu1 %v1872_v39 }
 0x15c   :  { %1543 = vmatprep.subr.mxu1 %v1735_v18 }
 0x15d   :  { %1544 = vmatpush3.msra.mxu1 %v1879_v40 }
 0x15e   :  { %1545 = vmatprep.subr.mxu1 %v1735_v18 }
 0x15f   :  { %1546 = vmatpush3.msra.mxu1 %v1886_v41 }
 0x160   :  { %1561 = vmatprep.subr.mxu1 %v1735_v18 }
 0x208   :  { %v1518_v51 = vpop.f32.mrf.mxu1 }
 0x209   :  { %v335_v52 = vadd.f32 %v1518_v51, %v1380_v50 }
 0x20a   :  { %v329_v53 = vpop.f32.mrf.mxu1 }
 0x20b   :  { %v330_v1 = vadd.f32 %v1380_v50, %v329_v53 }
 0x20c   :  { %v1521_v54 = vpop.f32.mrf.mxu1 }
 0x20d   :  { %v1924_v55 = vadd.f32 %v1521_v54, %v1380_v50 }
 0x20e   :  { %v339_v56 = vpop.f32.mrf.mxu1 }
 0x20f   :  { %v1926_v57 = vadd.f32 %v1380_v50, %v339_v56 }
 0x210   :  { %v1524_v58 = vpop.f32.mrf.mxu1 }
 0x211   :  { %v1928_v59 = vadd.f32 %v1524_v58, %v1380_v50 }
 0x212   :  { %v349_v60 = vpop.f32.mrf.mxu1 }
 0x213   :  { %v1930_v61 = vadd.f32 %v1380_v50, %v349_v60 }
 0x214   :  { %v1527_v62 = vpop.f32.mrf.mxu1 }
 0x215   :  { %v1932_v63 = vadd.f32 %v1527_v62, %v1380_v50 }
 0x216   :  { %v359_v0 = vpop.f32.mrf.mxu1 }
 0x217   :  { %v1934_v2 = vadd.f32 %v1380_v50, %v359_v0 }
 0x218   :  { %v442_v3 = vpop.f32.mrf.mxu1 }
 0x219   :  { %v446_v4 = vadd.f32 %v442_v3, %v330_v1 }
 0x21a   :  { %v1538_v5 = vpop.f32.mrf.mxu1 }
 0x21b   :  { %1646 = vtanh.f32 %v446_v4  ;;  %v1389_v7 = vmul.f32 -1.442695, %v446_v4 }
 0x21d   :  { %1648 = vpow2.f32 %v1389_v7 }
 0x228   :  { %v1647_v6 = vpop.eup %1646 }
 0x229   :  { %456 = vrot.lane.b32.xlu0 %v1647_v6, %s1737_s4 }
 0x22a   :  { %v1649_v8 = vpop.eup %1648 }
 0x22b   :  { %v450_v9 = vadd.f32 1.0, %v1649_v8 }
 0x22d   :  { %1650 = vrcp.f32 %v450_v9 }
 0x23a   :  { %v1651_v10 = vpop.eup %1650 }
 0x23b   :  { %v454_v13 = vmul.f32 0.0, %v1651_v10 }
 0x29b   :  { %v457_v11 = vpop.permute.xlu0 %456 }
 0x29c   :  { %v459_v12 = vmul.f32 %v1651_v10, %v457_v11 }
 0x29e   :  { %461 = vrot.lane.b32.xlu1 %v459_v12, %s1738_s30 }
 0x310   :  { %v462_v14 = vpop.permute.xlu1 %461 }
 0x311   :  { %v464_v15 = vadd.f32 %v462_v14, %v454_v13 }
 0x313   :  { %1652 = vtanh.f32 %v464_v15 }
 0x320   :  { %v1653_v16 = vpop.eup %1652 }
 0x321   :  { %467 = vrot.lane.b32.xlu0 %v1653_v16, %s1737_s4 }
 0x393   :  { %v468_v17 = vpop.permute.xlu0 %467 }
 0x394   :  { %v470_v19 = vmul.f32 %v1651_v10, %v468_v17 }
 0x396   :  { %472 = vrot.lane.b32.xlu1 %v470_v19, %s1738_s30 }
 0x408   :  { %v473_v20 = vpop.permute.xlu1 %472 }
 0x409   :  { %1548 = vmatmul.mubr.msk.f32.vlgmr.msra.gmra.mxu1 %vm372_vm11, %v473_v20 }
 0x40a   :  { %1562 = vmatpush3.msra.mxu1 %v1865_v38  ;;  %1569 = vmatprep.mubr.msk.f32.mxu1 %vm1736_vm9, %v1735_v18 }
 0x40b   :  { %1563 = vmatprep.subr.mxu1 %v1735_v18 }
 0x40c   :  { %1564 = vmatpush3.msra.mxu1 %v1872_v39 }
 0x40d   :  { %1565 = vmatprep.subr.mxu1 %v1735_v18 }
 0x40e   :  { %1566 = vmatpush3.msra.mxu1 %v1879_v40 }
 0x40f   :  { %1567 = vmatprep.subr.mxu1 %v1735_v18 }
 0x410   :  { %1568 = vmatpush3.msra.mxu1 %v1886_v41 }
 0x411   :  { %1583 = vmatprep.subr.mxu1 %v1735_v18 }
 0x4c9   :  { %v542_v21 = vpop.f32.mrf.mxu1 }
 0x4ca   :  { %v546_v22 = vadd.f32 %v542_v21, %v335_v52 }
 0x4cb   :  { %v1549_v23 = vpop.f32.mrf.mxu1 }
 0x4cc   :  { %1654 = vtanh.f32 %v546_v22  ;;  %v1391_v25 = vmul.f32 -1.442695, %v546_v22 }
 0x4ce   :  { %1656 = vpow2.f32 %v1391_v25 }
 0x4d9   :  { %v1655_v24 = vpop.eup %1654 }
 0x4da   :  { %556 = vrot.lane.b32.xlu0 %v1655_v24, %s1737_s4 }
 0x4db   :  { %v1657_v26 = vpop.eup %1656 }
 0x4dc   :  { %v550_v27 = vadd.f32 1.0, %v1657_v26 }
 0x4de   :  { %1658 = vrcp.f32 %v550_v27 }
 0x4eb   :  { %v1659_v28 = vpop.eup %1658 }
 0x4ec   :  { %v554_v31 = vmul.f32 %v1659_v28, %v464_v15 }
 0x54c   :  { %v557_v29 = vpop.permute.xlu0 %556 }
 0x54d   :  { %v559_v30 = vmul.f32 %v1659_v28, %v557_v29 }
 0x54f   :  { %561 = vrot.lane.b32.xlu1 %v559_v30, %s1738_s30 }
 0x5c1   :  { %v562_v32 = vpop.permute.xlu1 %561 }
 0x5c2   :  { %v564_v33 = vadd.f32 %v562_v32, %v554_v31 }
 0x5c4   :  { %1660 = vtanh.f32 %v564_v33 }
 0x5d1   :  { %v1661_v34 = vpop.eup %1660 }
 0x5d2   :  { %567 = vrot.lane.b32.xlu0 %v1661_v34, %s1737_s4 }
 0x644   :  { %v568_v35 = vpop.permute.xlu0 %567 }
 0x645   :  { %v570_v36 = vmul.f32 %v1659_v28, %v568_v35 }
 0x647   :  { %572 = vrot.lane.b32.xlu1 %v570_v36, %s1738_s30 }
 0x6b9   :  { %v573_v37 = vpop.permute.xlu1 %572 }
 0x6ba   :  { %1559 = vmatmul.mubr.msk.f32.vlgmr.msra.gmra.mxu0 %vm372_vm11, %v573_v37 }
 0x6bb   :  { %1573 = vmatpush3.msra.mxu0 %v1865_v38  ;;  %1580 = vmatprep.mubr.msk.f32.mxu0 %vm1736_vm9, %v1735_v18 }
 0x6bc   :  { %1574 = vmatprep.subr.mxu0 %v1735_v18 }
 0x6bd   :  { %1575 = vmatpush3.msra.mxu0 %v1872_v39 }
 0x6be   :  { %1576 = vmatprep.subr.mxu0 %v1735_v18 }
 0x6bf   :  { %1577 = vmatpush3.msra.mxu0 %v1879_v40 }
 0x6c0   :  { %1578 = vmatprep.subr.mxu0 %v1735_v18 }
 0x6c1   :  { %1579 = vmatpush3.msra.mxu0 %v1886_v41 }
 0x6c2   :  { %1594 = vmatprep.subr.mxu0 %v1735_v18 }
 0x77a   :  { %v642_v42 = vpop.f32.mrf.mxu0 }
 0x77b   :  { %v646_v43 = vadd.f32 %v642_v42, %v1926_v57 }
 0x77c   :  { %v1560_v44 = vpop.f32.mrf.mxu0 }
 0x77d   :  { %1662 = vtanh.f32 %v646_v43  ;;  %v1393_v46 = vmul.f32 -1.442695, %v646_v43 }
 0x77f   :  { %1664 = vpow2.f32 %v1393_v46 }
 0x78a   :  { %v1663_v45 = vpop.eup %1662 }
 0x78b   :  { %656 = vrot.lane.b32.xlu0 %v1663_v45, %s1737_s4 }
 0x78c   :  { %v1665_v47 = vpop.eup %1664 }
 0x78d   :  { %v650_v48 = vadd.f32 1.0, %v1665_v47 }
 0x78f   :  { %1666 = vrcp.f32 %v650_v48 }
 0x79c   :  { %v1667_v49 = vpop.eup %1666 }
 0x79d   :  { %v654_v52 = vmul.f32 %v1667_v49, %v564_v33 }
 0x7fd   :  { %v657_v50 = vpop.permute.xlu0 %656 }
 0x7fe   :  { %v659_v51 = vmul.f32 %v1667_v49, %v657_v50 }
 0x800   :  { %661 = vrot.lane.b32.xlu1 %v659_v51, %s1738_s30 }
 0x872   :  { %v662_v53 = vpop.permute.xlu1 %661 }
 0x873   :  { %v664_v54 = vadd.f32 %v662_v53, %v654_v52 }
 0x875   :  { %1668 = vtanh.f32 %v664_v54 }
 0x882   :  { %v1669_v56 = vpop.eup %1668 }
 0x883   :  { %667 = vrot.lane.b32.xlu0 %v1669_v56, %s1737_s4 }
 0x8f5   :  { %v668_v57 = vpop.permute.xlu0 %667 }
 0x8f6   :  { %v670_v58 = vmul.f32 %v1667_v49, %v668_v57 }
 0x8f8   :  { %672 = vrot.lane.b32.xlu1 %v670_v58, %s1738_s30 }
 0x96a   :  { %v673_v60 = vpop.permute.xlu1 %672 }
 0x96b   :  { %1570 = vmatmul.mubr.msk.f32.vlgmr.msra.gmra.mxu1 %vm372_vm11, %v673_v60 }
 0x96c   :  { %1584 = vmatpush3.msra.mxu1 %v1865_v38  ;;  %1591 = vmatprep.mubr.msk.f32.mxu1 %vm1736_vm9, %v1735_v18 }
 0x96d   :  { %1585 = vmatprep.subr.mxu1 %v1735_v18 }
 0x96e   :  { %1586 = vmatpush3.msra.mxu1 %v1872_v39 }
 0x96f   :  { %1587 = vmatprep.subr.mxu1 %v1735_v18 }
 0x970   :  { %1588 = vmatpush3.msra.mxu1 %v1879_v40 }
 0x971   :  { %1589 = vmatprep.subr.mxu1 %v1735_v18 }
 0x972   :  { %1590 = vmatpush3.msra.mxu1 %v1886_v41 }
 0x973   :  { %1605 = vmatprep.subr.mxu1 %v1735_v18 }
 0xa2b   :  { %v742_v62 = vpop.f32.mrf.mxu1 }
 0xa2c   :  { %v746_v0 = vadd.f32 %v742_v62, %v1924_v55 }
 0xa2d   :  { %v1571_v1 = vpop.f32.mrf.mxu1 }
 0xa2e   :  { %1670 = vtanh.f32 %v746_v0  ;;  %v1395_v4 = vmul.f32 -1.442695, %v746_v0 }
 0xa30   :  { %1672 = vpow2.f32 %v1395_v4 }
 0xa3b   :  { %v1671_v3 = vpop.eup %1670 }
 0xa3c   :  { %756 = vrot.lane.b32.xlu0 %v1671_v3, %s1737_s4 }
 0xa3d   :  { %v1673_v5 = vpop.eup %1672 }
 0xa3e   :  { %v750_v6 = vadd.f32 1.0, %v1673_v5 }
 0xa40   :  { %1674 = vrcp.f32 %v750_v6 }
 0xa4d   :  { %v1675_v7 = vpop.eup %1674 }
 0xa4e   :  { %v754_v10 = vmul.f32 %v1675_v7, %v664_v54 }
 0xaae   :  { %v757_v8 = vpop.permute.xlu0 %756 }
 0xaaf   :  { %v759_v9 = vmul.f32 %v1675_v7, %v757_v8 }
 0xab1   :  { %761 = vrot.lane.b32.xlu1 %v759_v9, %s1738_s30 }
 0xb23   :  { %v762_v11 = vpop.permute.xlu1 %761 }
 0xb24   :  { %v764_v12 = vadd.f32 %v762_v11, %v754_v10 }
 0xb26   :  { %1676 = vtanh.f32 %v764_v12 }
 0xb33   :  { %v1677_v55 = vpop.eup %1676 }
 0xb34   :  { %767 = vrot.lane.b32.xlu0 %v1677_v55, %s1737_s4 }
 0xba6   :  { %v768_v13 = vpop.permute.xlu0 %767 }
 0xba7   :  { %v770_v14 = vmul.f32 %v1675_v7, %v768_v13 }
 0xba9   :  { %772 = vrot.lane.b32.xlu1 %v770_v14, %s1738_s30 }
 0xc1b   :  { %v773_v15 = vpop.permute.xlu1 %772 }
 0xc1c   :  { %1581 = vmatmul.mubr.msk.f32.vlgmr.msra.gmra.mxu0 %vm372_vm11, %v773_v15 }
 0xc1d   :  { %1595 = vmatpush3.msra.mxu0 %v1865_v38  ;;  %1602 = vmatprep.mubr.msk.f32.mxu0 %vm1736_vm9, %v1735_v18 }
 0xc1e   :  { %1596 = vmatprep.subr.mxu0 %v1735_v18 }
 0xc1f   :  { %1597 = vmatpush3.msra.mxu0 %v1872_v39 }
 0xc20   :  { %1598 = vmatprep.subr.mxu0 %v1735_v18 }
 0xc21   :  { %1599 = vmatpush3.msra.mxu0 %v1879_v40 }
 0xc22   :  { %1600 = vmatprep.subr.mxu0 %v1735_v18 }
 0xc23   :  { %1601 = vmatpush3.msra.mxu0 %v1886_v41 }
 0xc24   :  { %1616 = vmatprep.subr.mxu0 %v1735_v18 }
 0xcdc   :  { %v842_v16 = vpop.f32.mrf.mxu0 }
 0xcdd   :  { %v846_v17 = vadd.f32 %v842_v16, %v1930_v61 }
 0xcde   :  { %v1582_v19 = vpop.f32.mrf.mxu0 }
 0xcdf   :  { %1678 = vtanh.f32 %v846_v17  ;;  %v1397_v21 = vmul.f32 -1.442695, %v846_v17  ;;  %v1173_v19 = vld [vmem:[%s2083_s5 + $0x10] sm:$0xff] }
 0xce1   :  { %1680 = vpow2.f32 %v1397_v21  ;;  %v1171_v21 = vld [vmem:[%s2083_s5] sm:$0xff] }
 0xcec   :  { %v1679_v20 = vpop.eup %1678 }
 0xced   :  { %856 = vrot.lane.b32.xlu0 %v1679_v20, %s1737_s4  ;;  %v1172_v20 = vld [vmem:[%s2083_s5 + $0x8] sm:$0xff] }
 0xcee   :  { %v1681_v22 = vpop.eup %1680 }
 0xcef   :  { %v850_v23 = vadd.f32 1.0, %v1681_v22 }
 0xcf1   :  { %1682 = vrcp.f32 %v850_v23  ;;  %v1261_v23 = vld [vmem:[%s2085_s7 + $0x18] sm:$0xff] }
 0xcfe   :  { %v1683_v24 = vpop.eup %1682 }
 0xcff   :  { %v854_v27 = vmul.f32 %v1683_v24, %v764_v12 }
 0xd5f   :  { %v857_v25 = vpop.permute.xlu0 %856 }
 0xd60   :  { %v859_v26 = vmul.f32 %v1683_v24, %v857_v25 }
 0xd62   :  { %861 = vrot.lane.b32.xlu1 %v859_v26, %s1738_s30 }
 0xdd4   :  { %v862_v28 = vpop.permute.xlu1 %861 }
 0xdd5   :  { %v864_v29 = vadd.f32 %v862_v28, %v854_v27  ;;  %v1260_v27 = vld [vmem:[%s2085_s7 + $0x10] sm:$0xff]  ;;  %v1259_v28 = vld [vmem:[%s2085_s7 + $0x8] sm:$0xff] }
 0xdd7   :  { %1684 = vtanh.f32 %v864_v29 }
 0xde4   :  { %v1685_v61 = vpop.eup %1684 }
 0xde5   :  { %867 = vrot.lane.b32.xlu0 %v1685_v61, %s1737_s4  ;;  %v1404_v61 = vld [vmem:[%s2084_s6] ss:$0 sm:$0xff]  ;;  %s1739_s6 = smov [#allocation2]  }
 0xe57   :  { %v868_v30 = vpop.permute.xlu0 %867 }
 0xe58   :  { %v870_v31 = vmul.f32 %v1683_v24, %v868_v30 }
 0xe5a   :  { %872 = vrot.lane.b32.xlu1 %v870_v31, %s1738_s30 }
 0xecc   :  { %v873_v32 = vpop.permute.xlu1 %872 }
 0xecd   :  { %1592 = vmatmul.mubr.msk.f32.vlgmr.msra.gmra.mxu1 %vm372_vm11, %v873_v32 }
 0xece   :  { %1606 = vmatpush3.msra.mxu1 %v1865_v38  ;;  %1613 = vmatprep.mubr.msk.f32.mxu1 %vm1736_vm9, %v1735_v18 }
 0xecf   :  { %1607 = vmatprep.subr.mxu1 %v1735_v18 }
 0xed0   :  { %1608 = vmatpush3.msra.mxu1 %v1872_v39 }
 0xed1   :  { %1609 = vmatprep.subr.mxu1 %v1735_v18 }
 0xed2   :  { %1610 = vmatpush3.msra.mxu1 %v1879_v40 }
 0xed3   :  { %1611 = vmatprep.subr.mxu1 %v1735_v18 }
 0xed4   :  { %1612 = vmatpush3.msra.mxu1 %v1886_v41 }
 0xed5   :  { %1627 = vmatprep.subr.mxu1 %v1735_v18 }
 0xf8d   :  { %v942_v33 = vpop.f32.mrf.mxu1 }
 0xf8e   :  { %v946_v38 = vadd.f32 %v942_v33, %v1928_v59 }
 0xf8f   :  { %v1593_v34 = vpop.f32.mrf.mxu1 }
 0xf90   :  { %1686 = vtanh.f32 %v946_v38  ;;  %v1399_v36 = vmul.f32 -1.442695, %v946_v38  ;;  %v1406_v38 = vld [vmem:[%s2086_s8] ss:$0 sm:$0xff] }
 0xf92   :  { %1688 = vpow2.f32 %v1399_v36 }
 0xf9d   :  { %v1687_v35 = vpop.eup %1686 }
 0xf9e   :  { %956 = vrot.lane.b32.xlu0 %v1687_v35, %s1737_s4 }
 0xf9f   :  { %v1689_v39 = vpop.eup %1688 }
 0xfa0   :  { %v950_v37 = vadd.f32 1.0, %v1689_v39 }
 0xfa2   :  { %1690 = vrcp.f32 %v950_v37 }
 0xfaf   :  { %v1691_v40 = vpop.eup %1690 }
 0xfb0   :  { %v954_v41 = vmul.f32 %v1691_v40, %v864_v29  ;;  %v1258_v29 = vld [vmem:[%s2085_s7] sm:$0xff]  ;;  %s1356_s7 = sshll.u32 %s1739_s6, 4  ;;  %s1357_s7 = int_to_ptr.vmem [resolvable:$true] %s1356_s7 }
 0xfb1   :  { %s1712_s26 = scalar_lea.vmem %s1357_s7, 128  ;;  %p1717_p1 = scmp.lt.s32.totalorder %s1357_s7, %s1357_s7 }
 0xfb2   :  { %p1713_p0 = scmp.ne.s32.totalorder %s1357_s7, %s1712_s26  ;;  %p1718_p2 = scmp.lt.s32.totalorder %s1712_s26, %s1712_s26 }
 0xfb4   :  { %p1719_p3 = por %p1718_p2, %p1717_p1 }
 0xfb6   :  { %p1720_p4 = pnand %p1719_p3, %p1713_p0 }
0x1010   :  { %v957_v42 = vpop.permute.xlu0 %956 }
0x1011   :  { %v959_v43 = vmul.f32 %v1691_v40, %v957_v42 }
0x1013   :  { %961 = vrot.lane.b32.xlu1 %v959_v43, %s1738_s30 }
0x1085   :  { %v962_v44 = vpop.permute.xlu1 %961 }
0x1086   :  { %v964_v45 = vadd.f32 %v962_v44, %v954_v41 }
0x1088   :  { %1692 = vtanh.f32 %v964_v45 }
0x1095   :  { %v1693_v59 = vpop.eup %1692 }
0x1096   :  { %967 = vrot.lane.b32.xlu0 %v1693_v59, %s1737_s4 }
0x1108   :  { %v968_v46 = vpop.permute.xlu0 %967 }
0x1109   :  { %v970_v47 = vmul.f32 %v1691_v40, %v968_v46 }
0x110b   :  { %972 = vrot.lane.b32.xlu1 %v970_v47, %s1738_s30 }
0x117d   :  { %v973_v48 = vpop.permute.xlu1 %972 }
0x117e   :  { %1603 = vmatmul.mubr.msk.f32.vlgmr.msra.gmra.mxu0 %vm372_vm11, %v973_v48 }
0x117f   :  { %1624 = vmatprep.mubr.msk.f32.mxu0 %vm1736_vm9, %v1735_v18 }
0x123e   :  { %v1042_v49 = vpop.f32.mrf.mxu0 }
0x123f   :  { %v1046_v50 = vadd.f32 %v1042_v49, %v1934_v2 }
0x1240   :  { %v1604_v51 = vpop.f32.mrf.mxu0 }
0x1241   :  { %1694 = vtanh.f32 %v1046_v50  ;;  %v1401_v53 = vmul.f32 -1.442695, %v1046_v50 }
0x1243   :  { %1696 = vpow2.f32 %v1401_v53 }
0x124e   :  { %v1695_v52 = vpop.eup %1694 }
0x124f   :  { %1056 = vrot.lane.b32.xlu0 %v1695_v52, %s1737_s4 }
0x1250   :  { %v1697_v54 = vpop.eup %1696 }
0x1251   :  { %v1050_v56 = vadd.f32 1.0, %v1697_v54 }
0x1253   :  { %1698 = vrcp.f32 %v1050_v56 }
0x1260   :  { %v1699_v57 = vpop.eup %1698 }
0x1261   :  { %v1054_v62 = vmul.f32 %v1699_v57, %v964_v45 }
0x12c1   :  { %v1057_v58 = vpop.permute.xlu0 %1056 }
0x12c2   :  { %v1059_v60 = vmul.f32 %v1699_v57, %v1057_v58 }
0x12c4   :  { %1061 = vrot.lane.b32.xlu1 %v1059_v60, %s1738_s30 }
0x1336   :  { %v1062_v0 = vpop.permute.xlu1 %1061 }
0x1337   :  { %v1064_v1 = vadd.f32 %v1062_v0, %v1054_v62 }
0x1339   :  { %1700 = vtanh.f32 %v1064_v1 }
0x1346   :  { %v1701_v2 = vpop.eup %1700 }
0x1347   :  { %1067 = vrot.lane.b32.xlu0 %v1701_v2, %s1737_s4 }
0x13b9   :  { %v1068_v3 = vpop.permute.xlu0 %1067 }
0x13ba   :  { %v1070_v4 = vmul.f32 %v1699_v57, %v1068_v3 }
0x13bc   :  { %1072 = vrot.lane.b32.xlu1 %v1070_v4, %s1738_s30 }
0x142e   :  { %v1073_v5 = vpop.permute.xlu1 %1072 }
0x142f   :  { %1614 = vmatmul.mubr.msk.f32.vlgmr.msra.gmra.mxu1 %vm372_vm11, %v1073_v5 }
0x1430   :  { %1635 = vmatprep.mubr.msk.f32.mxu1 %vm1736_vm9, %v1735_v18  ;;  %1628 = vmatpush3.msra.mxu1 %v1261_v23 }
0x1431   :  { %1629 = vmatprep.subr.mxu1 %v1735_v18 }
0x1432   :  { %1630 = vmatpush3.msra.mxu1 %v1260_v27 }
0x1433   :  { %1631 = vmatprep.subr.mxu1 %v1735_v18 }
0x1434   :  { %1632 = vmatpush3.msra.mxu1 %v1259_v28 }
0x1435   :  { %1633 = vmatprep.subr.mxu1 %v1735_v18 }
0x1436   :  { %1634 = vmatpush3.msra.mxu1 %v1258_v29 }
0x14ef   :  { %v1142_v6 = vpop.f32.mrf.mxu1 }
0x14f0   :  { %v1146_v7 = vadd.f32 %v1142_v6, %v1932_v63  ;;  %v1174_v63 = vld [vmem:[%s2083_s5 + $0x18] sm:$0xff] }
0x14f1   :  { %v1615_v8 = vpop.f32.mrf.mxu1  ;;  %1617 = vmatpush3.msra.mxu0 %v1174_v63 }
0x14f2   :  { %1702 = vtanh.f32 %v1146_v7  ;;  %v1403_v10 = vmul.f32 -1.442695, %v1146_v7  ;;  %1618 = vmatprep.subr.mxu0 %v1735_v18 }
0x14f3   :  { %1619 = vmatpush3.msra.mxu0 %v1173_v19 }
0x14f4   :  { %1704 = vpow2.f32 %v1403_v10  ;;  %1620 = vmatprep.subr.mxu0 %v1735_v18 }
0x14f5   :  { %1621 = vmatpush3.msra.mxu0 %v1172_v20 }
0x14f6   :  { %1622 = vmatprep.subr.mxu0 %v1735_v18 }
0x14f7   :  { %1623 = vmatpush3.msra.mxu0 %v1171_v21 }
0x14ff   :  { %v1703_v9 = vpop.eup %1702 }
0x1500   :  { %1156 = vrot.lane.b32.xlu0 %v1703_v9, %s1737_s4 }
0x1501   :  { %v1705_v11 = vpop.eup %1704 }
0x1502   :  { %v1150_v12 = vadd.f32 1.0, %v1705_v11 }
0x1504   :  { %1706 = vrcp.f32 %v1150_v12 }
0x1511   :  { %v1707_v55 = vpop.eup %1706 }
0x1512   :  { %v1154_v15 = vmul.f32 %v1707_v55, %v1064_v1 }
0x1572   :  { %v1157_v13 = vpop.permute.xlu0 %1156 }
0x1573   :  { %v1159_v14 = vmul.f32 %v1707_v55, %v1157_v13 }
0x1575   :  { %1161 = vrot.lane.b32.xlu1 %v1159_v14, %s1738_s30 }
0x15e7   :  { %v1162_v16 = vpop.permute.xlu1 %1161 }
0x15e8   :  { %v1164_v17 = vadd.f32 %v1162_v16, %v1154_v15 }
0x15ea   :  { %1708 = vtanh.f32 %v1164_v17 }
0x15f7   :  { %v1709_v22 = vpop.eup %1708 }
0x15f8   :  { %1167 = vrot.lane.b32.xlu0 %v1709_v22, %s1737_s4 }
0x166a   :  { %v1168_v24 = vpop.permute.xlu0 %1167 }
0x166b   :  { %v1170_v25 = vmul.f32 %v1707_v55, %v1168_v24 }
0x166d   :  { %1183 = vrot.lane.b32.xlu1 %v1170_v25, %s1738_s30 }
0x16df   :  { %v1184_v26 = vpop.permute.xlu1 %1183 }
0x16e0   :  { %1625 = vmatmul.mubr.msk.f32.vlgmr.msra.gmra.mxu0 %vm372_vm11, %v1184_v26 }
0x17a0   :  { %v1253_v30 = vpop.f32.mrf.mxu0 }
0x17a1   :  { %v1254_v31 = vadd.f32 %v1404_v61, %v1253_v30 }
0x17a2   :  { %v1626_v32 = vpop.f32.mrf.mxu0 }
0x17a3   :  { %v1257_v33 = vmax.f32 %v1254_v31, 0.0 }
0x17a5   :  { %1636 = vmatmul.mubr.msk.f32.vlgmr.msra.gmra.mxu1 %vm372_vm11, %v1257_v33 }
0x1865   :  { %v1338_v18 = vpop.f32.mrf.mxu1 }
0x1866   :  { %v1339_v34 = vadd.f32 %v1406_v38, %v1338_v18 }
0x1867   :  { %v1637_v35 = vpop.f32.mrf.mxu1 }
0x1868   :  { %v1342_v36 = vmul.f32 %v1339_v34, %v1339_v34 }
0x186a   :  { %v1343_v39 = vsel %vm372_vm11, %v1342_v36, 0.0 }
0x186b   :  { %1344 = vadd.xlane.f32.xlu0 %v1343_v39 }
0x18f4   :  { %v1345_v37 = vpop.xlane.xlu0 %1344 }
0x18f5   :  { %v1346_v40 = vmax.f32 %v1345_v37, 1e-24 }
0x18f7   :  { %1710 = vrsqrt.f32 %v1346_v40 }
0x1904   :  { %v1711_v42 = vpop.eup %1710 }
0x1905   :  { %v1348_v43 = vmul.f32 %v1711_v42, %v1339_v34 }
0x1907   :  { %1349 = vst.msk [vmem:[#allocation2] sm:$0xff] %vm372_vm11, %v1348_v43 }
0x1908   :  { %1723 = shalt.err (!%p1720_p4)
}
0x1909   :  { %1359 = dma.vmem_to_hbm [thread:$0]  %s1357_s7, 128, %s2087_s9, [#allocation3]  }
0x190a   :  { %1732 = dma.done.wait [#allocation3], 128  }
0x190b   :  { %1733 = vsyncadd [#allocation3], 4294967168 }
0x190c   :  { %1363 = vsyncpa [#allocation3], 1 }

</bundles_post_ra>
